<compile_context>
chip_gen: v7x
topology: tpu7x:2x2x1
jax: 0.10.0
libtpu: 0.0.40
codegen_flags: <defaults>
</compile_context>

<pallas_src>
import functools

import jax
import jax.numpy as jnp
from jax import lax
from jax.experimental import pallas as pl
from jax.experimental.pallas import tpu as pltpu

D_TOKEN = 48          # BatchNorm1d(48) / Linear(in_features=48)
D_PAD = 128           # token dim padded to full lane width
C_PAD = 128           # class dim padded to full lane width (lane-dense store)
BN_EPS = 1e-5         # nn.BatchNorm1d default eps
NEG_INF = -1e30       # mask value for padded logits


def _round_up(x, m):
    return ((x + m - 1) // m) * m


# --------------------------------------------------------------------------
# Kernel 1: FTTrans feature tokenizer + fused BN statistics (sum, sum of sq)
# --------------------------------------------------------------------------
def _tokenize_stats_kernel(num_ref, cat_ref, wnum_ref, table_ref, tokb_ref,
                           feat_ref, sum_ref, sumsq_ref,
                           *, batch, n_cat, cat_card, tile_b):
    tile = pl.program_id(0)

    # numeric part on MXU: [TB, Nn_pad] @ [Nn_pad, 128]
    feats = jnp.dot(num_ref[...], wnum_ref[...],
                    preferred_element_type=jnp.float32)             # [TB, 128]

    # categorical part, fused gather-as-matmul:
    #   multi-hot [TB, K_pad] @ [K_pad, 128]  (K = n_cat * cardinality)
    k_pad = table_ref.shape[0]
    flat = cat_ref[...] + lax.broadcasted_iota(
        jnp.int32, cat_ref.shape, 1) * cat_card                     # [TB, Fc]
    col = lax.broadcasted_iota(jnp.int32, (tile_b, k_pad), 1)       # [TB, K]
    multi = jnp.zeros((tile_b, k_pad), jnp.float32)
    for f in range(n_cat):                                          # static, tiny
        multi = multi + (col == flat[:, f:f + 1]).astype(jnp.float32)
    feats = feats + jnp.dot(multi, table_ref[...],
                            preferred_element_type=jnp.float32)
    feats = feats + tokb_ref[...]                                   # [TB, 128]

    feat_ref[...] = feats                                           # lane-dense

    # rows of this tile that belong to the real (unpadded) batch
    row = tile * tile_b + lax.broadcasted_iota(jnp.int32, (tile_b, 1), 0)
    valid = row < batch                                             # [TB, 1]
    fm = jnp.where(valid, feats, 0.0)

    @pl.when(tile == 0)
    def _():
        sum_ref[...] = jnp.zeros_like(sum_ref)
        sumsq_ref[...] = jnp.zeros_like(sumsq_ref)

    sum_ref[...] += jnp.sum(fm, axis=0, keepdims=True)
    sumsq_ref[...] += jnp.sum(fm * fm, axis=0, keepdims=True)


# --------------------------------------------------------------------------
# Kernel 2: BN normalize + ReLU + Linear(48->C, no bias) + softmax
# --------------------------------------------------------------------------
def _head_kernel(feat_ref, sum_ref, sumsq_ref, gamma_ref, beta_ref,
                 wdense_ref, out_ref, *, batch, class_num):
    inv_n = 1.0 / batch                                             # biased var
    mean = sum_ref[...] * inv_n                                     # [1, 128]
    var = jnp.maximum(sumsq_ref[...] * inv_n - mean * mean, 0.0)
    h = (feat_ref[...] - mean) * lax.rsqrt(var + BN_EPS)
    h = h * gamma_ref[...] + beta_ref[...]
    h = jnp.maximum(h, 0.0)                                         # ReLU

    logits = jnp.dot(h, wdense_ref[...],
                     preferred_element_type=jnp.float32)            # [TB, 128]
    ccol = lax.broadcasted_iota(jnp.int32, logits.shape, 1)
    logits = jnp.where(ccol < class_num, logits, NEG_INF)           # mask pads

    m = jnp.max(logits, axis=1, keepdims=True)
    e = jnp.exp(logits - m)
    s = jnp.sum(e, axis=1, keepdims=True)
    out_ref[...] = e / s                                            # lane-dense


def init_params(key, n_num, n_cat, cat_cardinality, class_num):
    k1, k2, k3, k4, k5, k6 = jax.random.split(key, 6)
    return {
        # FTTrans tokenizer surrogate
        "w_num": jax.random.normal(k1, (n_num, D_TOKEN), jnp.float32) * 0.1,
        "cat_emb": jax.random.normal(
            k2, (n_cat, cat_cardinality, D_TOKEN), jnp.float32) * 0.1,
        "tok_bias": jax.random.normal(k3, (1, D_TOKEN), jnp.float32) * 0.1,
        # BatchNorm1d(48) affine params (PyTorch init: gamma=1, beta=0; small
        # deterministic perturbation so the affine path is exercised)
        "gamma": jnp.ones((1, D_TOKEN), jnp.float32)
                 + 0.01 * jax.random.normal(k4, (1, D_TOKEN), jnp.float32),
        "beta": 0.01 * jax.random.normal(k5, (1, D_TOKEN), jnp.float32),
        # Linear(48, class_num, bias=False) — stored as [48, C] (x @ W)
        "w_dense": jax.random.normal(k6, (D_TOKEN, class_num), jnp.float32) * 0.1,
    }


def ft_model_forward(x, params, num_idx, cat_idx, *, tile_b=None):
    """x: [B, F] float32; columns in cat_idx hold integer category codes."""
    B = x.shape[0]
    class_num = params["w_dense"].shape[1]
    n_num = len(num_idx)
    n_cat = len(cat_idx)
    cat_card = params["cat_emb"].shape[1]
    assert n_num > 0 and n_cat > 0  # TODO(synk): empty-branch variants unused

    # ---- column split (glue, plain JAX) -----------------------------------
    num = x[:, jnp.asarray(num_idx)].astype(jnp.float32)            # [B, Fn]
    cat = x[:, jnp.asarray(cat_idx)].astype(jnp.int32)              # [B, Fc]

    # ---- pad to lane/sublane-friendly, MXU-friendly shapes ----------------
    n_num_pad = _round_up(n_num, 8)
    k = n_cat * cat_card
    k_pad = _round_up(k, 8)

    if tile_b is None:
        tile_b = min(512, _round_up(B, 8))
    tile_b = _round_up(tile_b, 8)
    b_pad = _round_up(B, tile_b)
    nb = b_pad // tile_b

    num_p = jnp.zeros((b_pad, n_num_pad), jnp.float32).at[:B, :n_num].set(num)
    cat_p = jnp.zeros((b_pad, n_cat), jnp.int32).at[:B, :].set(cat)

    w_num = jnp.zeros((n_num_pad, D_PAD), jnp.float32).at[
        :n_num, :D_TOKEN].set(params["w_num"])
    table = jnp.zeros((k_pad, D_PAD), jnp.float32).at[
        :k, :D_TOKEN].set(params["cat_emb"].reshape(k, D_TOKEN))
    tok_b = jnp.zeros((1, D_PAD), jnp.float32).at[:, :D_TOKEN].set(
        params["tok_bias"])
    gamma = jnp.zeros((1, D_PAD), jnp.float32).at[:, :D_TOKEN].set(
        params["gamma"])
    beta = jnp.zeros((1, D_PAD), jnp.float32).at[:, :D_TOKEN].set(
        params["beta"])
    w_dense = jnp.zeros((D_PAD, C_PAD), jnp.float32).at[
        :D_TOKEN, :class_num].set(params["w_dense"])

    tilemap = lambda i: (i, 0)   # depends on batch tile only
    fixmap = lambda i: (0, 0)    # resident weights / accumulator outputs

    # ---- call 1: tokenizer + BN statistics --------------------------------
    tok_kernel = functools.partial(
        _tokenize_stats_kernel, batch=B, n_cat=n_cat,
        cat_card=cat_card, tile_b=tile_b)

    feats, ssum, ssq = pl.pallas_call(
        tok_kernel,
        out_shape=(
            jax.ShapeDtypeStruct((b_pad, D_PAD), jnp.float32),   # features
            jax.ShapeDtypeStruct((1, D_PAD), jnp.float32),       # sum
            jax.ShapeDtypeStruct((1, D_PAD), jnp.float32),       # sum of sq
        ),
        grid=(nb,),
        in_specs=[
            pl.BlockSpec((tile_b, n_num_pad), tilemap),   # numeric cols
            pl.BlockSpec((tile_b, n_cat), tilemap),       # categorical codes
            pl.BlockSpec((n_num_pad, D_PAD), fixmap),     # tokenizer weight
            pl.BlockSpec((k_pad, D_PAD), fixmap),         # cat embedding table
            pl.BlockSpec((1, D_PAD), fixmap),             # tokenizer bias
        ],
        out_specs=(
            pl.BlockSpec((tile_b, D_PAD), tilemap),
            pl.BlockSpec((1, D_PAD), fixmap),             # accumulator output
            pl.BlockSpec((1, D_PAD), fixmap),             # accumulator output
        ),
        # batch-tile axis carries the BN-stats accumulation -> "arbitrary"
        compiler_params=pltpu.CompilerParams(
            dimension_semantics=("arbitrary",)),
    )(num_p, cat_p, w_num, table, tok_b)

    # ---- call 2: BN normalize + ReLU + dense + softmax ---------------------
    head_kernel = functools.partial(
        _head_kernel, batch=B, class_num=class_num)

    out = pl.pallas_call(
        head_kernel,
        out_shape=jax.ShapeDtypeStruct((b_pad, C_PAD), jnp.float32),
        grid=(nb,),
        in_specs=[
            pl.BlockSpec((tile_b, D_PAD), tilemap),       # features
            pl.BlockSpec((1, D_PAD), fixmap),             # sum
            pl.BlockSpec((1, D_PAD), fixmap),             # sum of sq
            pl.BlockSpec((1, D_PAD), fixmap),             # bn gamma
            pl.BlockSpec((1, D_PAD), fixmap),             # bn beta
            pl.BlockSpec((D_PAD, C_PAD), fixmap),         # dense weight
        ],
        out_specs=pl.BlockSpec((tile_b, C_PAD), tilemap),
        compiler_params=pltpu.CompilerParams(
            dimension_semantics=("parallel",)),
    )(feats, ssum, ssq, gamma, beta, w_dense)

    return out[:B, :class_num]


def ft_model_reference(x, params, num_idx, cat_idx):
    """Pure-JAX reference with the PyTorch forward semantics."""
    num = x[:, jnp.asarray(num_idx)]
    cat = x[:, jnp.asarray(cat_idx)].astype(jnp.int32)
    feats = num @ params["w_num"]
    n_cat = cat.shape[1]
    gathered = params["cat_emb"][jnp.arange(n_cat)[None, :], cat]   # [B,Fc,48]
    feats = feats + gathered.sum(axis=1) + params["tok_bias"]
    mean = feats.mean(axis=0, keepdims=True)
    var = ((feats - mean) ** 2).mean(axis=0, keepdims=True)         # biased
    h = (feats - mean) * jax.lax.rsqrt(var + BN_EPS)
    h = h * params["gamma"] + params["beta"]
    h = jnp.maximum(h, 0.0)
    logits = h @ params["w_dense"]
    return jax.nn.softmax(logits, axis=1)


if __name__ == "__main__":
    key = jax.random.PRNGKey(0)
    B = 8                          # batch
    NUM_IDX = [0, 1, 2, 3, 4, 5]   # numeric columns
    CAT_IDX = [6, 7, 8, 9]         # categorical columns
    CARD = 5                       # categorical cardinality
    CLASS_NUM = 3

    k_num, k_cat, k_param = jax.random.split(key, 3)
    x_num = jax.random.normal(k_num, (B, len(NUM_IDX)), jnp.float32)
    x_cat = jax.random.randint(k_cat, (B, len(CAT_IDX)), 0, CARD).astype(jnp.float32)
    x = jnp.concatenate([x_num, x_cat], axis=1)            # [B, 10]

    params = init_params(k_param, len(NUM_IDX), len(CAT_IDX), CARD, CLASS_NUM)

    out = ft_model_forward(x, params, NUM_IDX, CAT_IDX)
    out = jax.block_until_ready(out)
    ref = ft_model_reference(x, params, NUM_IDX, CAT_IDX)

    assert out.shape == (B, CLASS_NUM)
    assert bool(jnp.all(jnp.isfinite(out)))
    # softmax rows sum to 1
    assert bool(jnp.allclose(jnp.sum(out, axis=1), 1.0, atol=1e-3))
    # matches the pure-JAX / PyTorch-semantics reference
    assert bool(jnp.allclose(out, ref, atol=5e-3))
    print("KERNEL_OK")
</pallas_src>

<mosaic_0001>
module attributes {stable_mosaic.version = 11 : i64} {
  func.func @_tokenize_stats_kernel(%arg0: i32, %arg1: memref<8x8xf32, #tpu.memory_space<vmem>>, %arg2: memref<8x4xi32, #tpu.memory_space<vmem>>, %arg3: memref<8x128xf32, #tpu.memory_space<vmem>>, %arg4: memref<24x128xf32, #tpu.memory_space<vmem>>, %arg5: memref<1x128xf32, #tpu.memory_space<vmem>>, %arg6: memref<8x128xf32, #tpu.memory_space<vmem>>, %arg7: memref<1x128xf32, #tpu.memory_space<vmem>>, %arg8: memref<1x128xf32, #tpu.memory_space<vmem>>) attributes {dimension_semantics = [#tpu.dimension_semantics<arbitrary>], iteration_bounds = array<i64: 1>, scalar_prefetch = 0 : i64, scratch_operands = 0 : i64, tpu.core_type = #tpu.core_type<tc>, window_params = [{transform_indices = @transform_0, window_bounds = array<i64: 8, 8>}, {transform_indices = @transform_1, window_bounds = array<i64: 8, 4>}, {pipeline_mode = #tpu.pipeline_mode<synchronous>, transform_indices = @transform_2, window_bounds = array<i64: 8, 128>}, {pipeline_mode = #tpu.pipeline_mode<synchronous>, transform_indices = @transform_3, window_bounds = array<i64: 24, 128>}, {pipeline_mode = #tpu.pipeline_mode<synchronous>, transform_indices = @transform_4, window_bounds = array<i64: 1, 128>}, {transform_indices = @transform_5, window_bounds = array<i64: 8, 128>}, {pipeline_mode = #tpu.pipeline_mode<synchronous>, transform_indices = @transform_6, window_bounds = array<i64: 1, 128>}, {pipeline_mode = #tpu.pipeline_mode<synchronous>, transform_indices = @transform_7, window_bounds = array<i64: 1, 128>}]} {
    %c0 = arith.constant 0 : index
    %c0_0 = arith.constant 0 : index
    %0 = vector.load %arg1[%c0, %c0_0] : memref<8x8xf32, #tpu.memory_space<vmem>>, vector<8x8xf32>
    %c0_1 = arith.constant 0 : index
    %c0_2 = arith.constant 0 : index
    %1 = vector.load %arg3[%c0_1, %c0_2] : memref<8x128xf32, #tpu.memory_space<vmem>>, vector<8x128xf32>
    %cst = arith.constant dense<0.000000e+00> : vector<8x128xf32>
    %2 = tpu.matmul %0, %1, %cst {dimension_numbers = #tpu.dot_dimension_numbers<[1], [0], [0], [1], [0, 0, 1, 1], [], []>} : vector<8x8xf32>, vector<8x128xf32>, vector<8x128xf32> -> vector<8x128xf32>
    %c0_3 = arith.constant 0 : index
    %c0_4 = arith.constant 0 : index
    %3 = vector.load %arg2[%c0_3, %c0_4] : memref<8x4xi32, #tpu.memory_space<vmem>>, vector<8x4xi32>
    %4 = tpu.iota {dimensions = array<i32: 1>} : vector<8x4xi32>
    %c5_i32 = arith.constant 5 : i32
    %5 = vector.broadcast %c5_i32 : i32 to vector<8x4xi32>
    %6 = arith.muli %4, %5 : vector<8x4xi32>
    %7 = arith.addi %3, %6 : vector<8x4xi32>
    %8 = tpu.iota {dimensions = array<i32: 1>} : vector<8x24xi32>
    %cst_5 = arith.constant 0.000000e+00 : f32
    %9 = vector.broadcast %cst_5 : f32 to vector<8x24xf32>
    %10 = vector.extract_strided_slice %7 {offsets = [0, 0], sizes = [8, 1], strides = [1, 1]} : vector<8x4xi32> to vector<8x1xi32>
    %11 = vector.broadcast %10 : vector<8x1xi32> to vector<8x24xi32>
    %12 = arith.cmpi eq, %8, %11 : vector<8x24xi32>
    %13 = arith.extui %12 : vector<8x24xi1> to vector<8x24xi32>
    %14 = arith.sitofp %13 : vector<8x24xi32> to vector<8x24xf32>
    %15 = arith.addf %9, %14 : vector<8x24xf32>
    %16 = vector.extract_strided_slice %7 {offsets = [0, 1], sizes = [8, 1], strides = [1, 1]} : vector<8x4xi32> to vector<8x1xi32>
    %17 = vector.broadcast %16 : vector<8x1xi32> to vector<8x24xi32>
    %18 = arith.cmpi eq, %8, %17 : vector<8x24xi32>
    %19 = arith.extui %18 : vector<8x24xi1> to vector<8x24xi32>
    %20 = arith.sitofp %19 : vector<8x24xi32> to vector<8x24xf32>
    %21 = arith.addf %15, %20 : vector<8x24xf32>
    %22 = vector.extract_strided_slice %7 {offsets = [0, 2], sizes = [8, 1], strides = [1, 1]} : vector<8x4xi32> to vector<8x1xi32>
    %23 = vector.broadcast %22 : vector<8x1xi32> to vector<8x24xi32>
    %24 = arith.cmpi eq, %8, %23 : vector<8x24xi32>
    %25 = arith.extui %24 : vector<8x24xi1> to vector<8x24xi32>
    %26 = arith.sitofp %25 : vector<8x24xi32> to vector<8x24xf32>
    %27 = arith.addf %21, %26 : vector<8x24xf32>
    %28 = vector.extract_strided_slice %7 {offsets = [0, 3], sizes = [8, 1], strides = [1, 1]} : vector<8x4xi32> to vector<8x1xi32>
    %29 = vector.broadcast %28 : vector<8x1xi32> to vector<8x24xi32>
    %30 = arith.cmpi eq, %8, %29 : vector<8x24xi32>
    %31 = arith.extui %30 : vector<8x24xi1> to vector<8x24xi32>
    %32 = arith.sitofp %31 : vector<8x24xi32> to vector<8x24xf32>
    %33 = arith.addf %27, %32 : vector<8x24xf32>
    %c0_6 = arith.constant 0 : index
    %c0_7 = arith.constant 0 : index
    %34 = vector.load %arg4[%c0_6, %c0_7] : memref<24x128xf32, #tpu.memory_space<vmem>>, vector<24x128xf32>
    %cst_8 = arith.constant dense<0.000000e+00> : vector<8x128xf32>
    %35 = tpu.matmul %33, %34, %cst_8 {dimension_numbers = #tpu.dot_dimension_numbers<[1], [0], [0], [1], [0, 0, 1, 1], [], []>} : vector<8x24xf32>, vector<24x128xf32>, vector<8x128xf32> -> vector<8x128xf32>
    %36 = arith.addf %2, %35 : vector<8x128xf32>
    %c0_9 = arith.constant 0 : index
    %c0_10 = arith.constant 0 : index
    %37 = vector.load %arg5[%c0_9, %c0_10] : memref<1x128xf32, #tpu.memory_space<vmem>>, vector<1x128xf32>
    %38 = vector.broadcast %37 : vector<1x128xf32> to vector<8x128xf32>
    %39 = arith.addf %36, %38 : vector<8x128xf32>
    %c0_11 = arith.constant 0 : index
    %c0_12 = arith.constant 0 : index
    %40 = vector.load %arg6[%c0_11, %c0_12] : memref<8x128xf32, #tpu.memory_space<vmem>>, vector<8x128xf32>
    tpu.vector_store %arg6[%c0_11, %c0_12], %39 {strides = array<i32>} : memref<8x128xf32, #tpu.memory_space<vmem>>, vector<8x128xf32>,
    %c8_i32 = arith.constant 8 : i32
    %41 = arith.muli %arg0, %c8_i32 : i32
    %42 = tpu.iota {dimensions = array<i32: 0>} : vector<8x1xi32>
    %43 = vector.broadcast %41 : i32 to vector<8x1xi32>
    %44 = arith.addi %43, %42 : vector<8x1xi32>
    %c8_i32_13 = arith.constant 8 : i32
    %45 = vector.broadcast %c8_i32_13 : i32 to vector<8x1xi32>
    %46 = arith.cmpi slt, %44, %45 : vector<8x1xi32>
    %cst_14 = arith.constant 0.000000e+00 : f32
    %47 = vector.shape_cast %46 : vector<8x1xi1> to vector<8x1xi1>
    %48 = vector.broadcast %47 : vector<8x1xi1> to vector<8x128xi1>
    %49 = vector.broadcast %cst_14 : f32 to vector<8x128xf32>
    %50 = arith.select %48, %39, %49 : vector<8x128xi1>, vector<8x128xf32>
    %c0_i32 = arith.constant 0 : i32
    %51 = arith.cmpi eq, %arg0, %c0_i32 : i32
    %52 = arith.extui %51 : i1 to i32
    %c0_i32_15 = arith.constant 0 : i32
    %53 = arith.cmpi ne, %52, %c0_i32_15 : i32
    scf.if %53 {
      %cst_26 = arith.constant 0.000000e+00 : f32
      %65 = vector.broadcast %cst_26 : f32 to vector<1x128xf32>
      %c0_27 = arith.constant 0 : index
      %c0_28 = arith.constant 0 : index
      %66 = vector.load %arg7[%c0_27, %c0_28] : memref<1x128xf32, #tpu.memory_space<vmem>>, vector<1x128xf32>
      tpu.vector_store %arg7[%c0_27, %c0_28], %65 {strides = array<i32>} : memref<1x128xf32, #tpu.memory_space<vmem>>, vector<1x128xf32>,
      %cst_29 = arith.constant 0.000000e+00 : f32
      %67 = vector.broadcast %cst_29 : f32 to vector<1x128xf32>
      %c0_30 = arith.constant 0 : index
      %c0_31 = arith.constant 0 : index
      %68 = vector.load %arg8[%c0_30, %c0_31] : memref<1x128xf32, #tpu.memory_space<vmem>>, vector<1x128xf32>
      tpu.vector_store %arg8[%c0_30, %c0_31], %67 {strides = array<i32>} : memref<1x128xf32, #tpu.memory_space<vmem>>, vector<1x128xf32>,
    } else {
    }
    %c0_16 = arith.constant 0 : index
    %c0_17 = arith.constant 0 : index
    %54 = vector.load %arg7[%c0_16, %c0_17] : memref<1x128xf32, #tpu.memory_space<vmem>>, vector<1x128xf32>
    %cst_18 = arith.constant dense<0.000000e+00> : vector<128xf32>
    %55 = vector.multi_reduction <add>, %50, %cst_18 [0] : vector<8x128xf32> to vector<128xf32>
    %56 = vector.shape_cast %55 : vector<128xf32> to vector<1x128xf32>
    %57 = arith.addf %54, %56 : vector<1x128xf32>
    %c0_19 = arith.constant 0 : index
    %c0_20 = arith.constant 0 : index
    %58 = vector.load %arg7[%c0_19, %c0_20] : memref<1x128xf32, #tpu.memory_space<vmem>>, vector<1x128xf32>
    tpu.vector_store %arg7[%c0_19, %c0_20], %57 {strides = array<i32>} : memref<1x128xf32, #tpu.memory_space<vmem>>, vector<1x128xf32>,
    %c0_21 = arith.constant 0 : index
    %c0_22 = arith.constant 0 : index
    %59 = vector.load %arg8[%c0_21, %c0_22] : memref<1x128xf32, #tpu.memory_space<vmem>>, vector<1x128xf32>
    %60 = arith.mulf %50, %50 : vector<8x128xf32>
    %cst_23 = arith.constant dense<0.000000e+00> : vector<128xf32>
    %61 = vector.multi_reduction <add>, %60, %cst_23 [0] : vector<8x128xf32> to vector<128xf32>
    %62 = vector.shape_cast %61 : vector<128xf32> to vector<1x128xf32>
    %63 = arith.addf %59, %62 : vector<1x128xf32>
    %c0_24 = arith.constant 0 : index
    %c0_25 = arith.constant 0 : index
    %64 = vector.load %arg8[%c0_24, %c0_25] : memref<1x128xf32, #tpu.memory_space<vmem>>, vector<1x128xf32>
    tpu.vector_store %arg8[%c0_24, %c0_25], %63 {strides = array<i32>} : memref<1x128xf32, #tpu.memory_space<vmem>>, vector<1x128xf32>,
    return
  }
  func.func @transform_0(%arg0: i32) -> (i32, i32) {
    %c0_i32 = arith.constant 0 : i32
    %c0_i32_0 = arith.constant 0 : i32
    return %arg0, %c0_i32 : i32, i32
  }
  func.func @transform_1(%arg0: i32) -> (i32, i32) {
    %c0_i32 = arith.constant 0 : i32
    %c0_i32_0 = arith.constant 0 : i32
    return %arg0, %c0_i32 : i32, i32
  }
  func.func @transform_2(%arg0: i32) -> (i32, i32) {
    %c0_i32 = arith.constant 0 : i32
    %c0_i32_0 = arith.constant 0 : i32
    %c0_i32_1 = arith.constant 0 : i32
    return %c0_i32, %c0_i32_0 : i32, i32
  }
  func.func @transform_3(%arg0: i32) -> (i32, i32) {
    %c0_i32 = arith.constant 0 : i32
    %c0_i32_0 = arith.constant 0 : i32
    %c0_i32_1 = arith.constant 0 : i32
    return %c0_i32, %c0_i32_0 : i32, i32
  }
  func.func @transform_4(%arg0: i32) -> (i32, i32) {
    %c0_i32 = arith.constant 0 : i32
    %c0_i32_0 = arith.constant 0 : i32
    %c0_i32_1 = arith.constant 0 : i32
    return %c0_i32, %c0_i32_0 : i32, i32
  }
  func.func @transform_5(%arg0: i32) -> (i32, i32) {
    %c0_i32 = arith.constant 0 : i32
    %c0_i32_0 = arith.constant 0 : i32
    return %arg0, %c0_i32 : i32, i32
  }
  func.func @transform_6(%arg0: i32) -> (i32, i32) {
    %c0_i32 = arith.constant 0 : i32
    %c0_i32_0 = arith.constant 0 : i32
    %c0_i32_1 = arith.constant 0 : i32
    return %c0_i32, %c0_i32_0 : i32, i32
  }
  func.func @transform_7(%arg0: i32) -> (i32, i32) {
    %c0_i32 = arith.constant 0 : i32
    %c0_i32_0 = arith.constant 0 : i32
    %c0_i32_1 = arith.constant 0 : i32
    return %c0_i32, %c0_i32_0 : i32, i32
  }
}

</mosaic_0001>

<bundles_post_ra>
// kernel: tpu_custom_call.1
= control target key start
LH: loop header
LB: loop body
LE: loop exit
PB: predicated region body
PF: predicated region fallthrough
CT: control target
= control target key end

     0   :  { %13 = vsyncpa [#allocation3], 0  ;;  %s573_s0 = inlined_call_operand.vmem [shape: f32[8,8], index: 0, kind: input, shape index: {}]   ;;  %s574_s1 = inlined_call_operand.vmem [shape: s32[8,4], index: 1, kind: input, shape index: {}]   ;;  %s575_s2 = inlined_call_operand.vmem [shape: f32[8,128], index: 2, kind: input, shape index: {}]   ;;  %s576_s3 = inlined_call_operand.hbm [shape: f32[24,128], index: 3, kind: input, shape index: {}]   ;;  %s577_s4 = inlined_call_operand.vmem [shape: f32[1,128], index: 4, kind: input, shape index: {}]   ;;  %s578_s5 = inlined_call_operand.hbm [shape: f32[8,128], index: 5, kind: output, shape index: {0}]   ;;  %s579_s6 = inlined_call_operand.hbm [shape: f32[1,128], index: 6, kind: output, shape index: {1}]   ;;  %s580_s7 = inlined_call_operand.hbm [shape: f32[1,128], index: 7, kind: output, shape index: {2}]  }
   0x1   :  { %14 = vsyncpa [#allocation4], 0 }
   0x2   :  { %15 = vsyncpa [#allocation7], 0  ;;  %s452_s24 = smov [#allocation2]   ;;  %s358_s28 = scalar_lea.hbm %s576_s3, 384 }
   0x3   :  { %s27_s25 = sshll.u32 %s452_s24, 4  ;;  %p359_p0 = scmp.ne.s32.totalorder %s576_s3, %s358_s28  ;;  %s28_s25 = int_to_ptr.vmem [resolvable:$true] %s27_s25 }
   0x4   :  { %p362_p1 = scmp.lt.u32.totalorder %s358_s28, %s576_s3 }
   0x6   :  { %p364_p2 = pnand %p362_p1, %p359_p0 }
   0x8   :  { %367 = shalt.err (!%p364_p2)
}
   0x9   :  { %s368_s10 = scalar_lea.vmem %s28_s25, 384  ;;  %p373_p4 = scmp.lt.s32.totalorder %s28_s25, %s28_s25 }
   0xa   :  { %p369_p3 = scmp.ne.s32.totalorder %s28_s25, %s368_s10  ;;  %p374_p5 = scmp.lt.s32.totalorder %s368_s10, %s368_s10 }
   0xc   :  { %p375_p6 = por %p374_p5, %p373_p4 }
   0xe   :  { %p376_p7 = pnand %p375_p6, %p369_p3 }
  0x10   :  { %379 = shalt.err (!%p376_p7)
}
  0x11   :  { %s453_s11 = smov 128   ;;  %s454_s12 = smov 8  }
  0x12   :  { %33 = dma.hbm_to_vmem [thread:$0]  %s576_s3, 384, %s28_s25, [#allocation3], %s453_s11, %s453_s11, %s454_s12  }
  0x13   :  { %446 = dma.done.wait [#allocation3], 384  }
  0x14   :  { %447 = vsyncadd [#allocation3], 4294966912  ;;  %v42_v0 = vlaneseq  ;;  %v455_v1 = vmov 0   ;;  %v456_v2 = vmov 2   ;;  %v457_v4 = vmov 0.0   ;;  %v41_v6 = vld [vmem:[%s574_s1] sm:$0xff] }
  0x15   :  { %353 = vset.pattern.permute.xlu0 %v455_v1  ;;  %355 = vset.pattern.permute.xlu1 %v456_v2  ;;  %247 = vst [vmem:[#allocation6] sm:$0x1] %v457_v4  ;;  %248 = vst [vmem:[#allocation8] sm:$0x1] %v457_v4  ;;  %v458_v8 = vmov 1   ;;  %v459_v9 = vmov 3  }
  0x16   :  { %v43_v3 = vand.u32 127, %v42_v0  ;;  %332 = vmatprep.subr.mxu1 %v457_v4  ;;  %v74_v10 = vld [vmem:[#allocation2] sm:$0xff]  ;;  %v75_v11 = vld [vmem:[#allocation2 + $0x8] sm:$0xff]  ;;  %v460_v13 = vmov 0.0|0.0   ;;  %vm461_vm0 = vmmov 0   ;;  %v76_v15 = vld [vmem:[#allocation2 + $0x10] sm:$0xff] }
  0x17   :  { %v338_v12 = vpack.c.bf16 %v75_v11, %v74_v10  ;;  %337 = vmatprep.subr.bf16.mxu0 %v460_v13  ;;  %v40_v14 = vld [vmem:[%s575_s2] sm:$0xff]  ;;  %334 = vmatprep.mubr.msk.f32.mxu1 %vm461_vm0, %v457_v4  ;;  %vm151_vm1 = vcmask 64512   ;;  %vm77_vm6 = vcmask 195584   ;;  %s462_s19 = smov [#allocation5]  }
  0x18   :  { %v44_v5 = vmul.u32 5, %v43_v3  ;;  %333 = vmatpush3.msra.mxu1 %v40_v14  ;;  %v39_v16 = vld [vmem:[%s573_s0] sm:$0xff]  ;;  %329 = vmatprep.mubr.msk.f32.mxu0 %vm461_vm0, %v457_v4  ;;  %s274_s20 = sshll.u32 %s462_s19, 4  ;;  %s275_s20 = int_to_ptr.vmem [resolvable:$true] %s274_s20 }
  0x19   :  { %339 = vmatpush3.bf16.msra.mxu0 %v338_v12  ;;  %335 = vmatmul.mubr.msk.f32.vlgmr.msra.gmra.mrb[0].mxu1 %vm151_vm1, %v39_v16  ;;  %v316_v31 = vld [vmem:[%s577_s4] ss:$0 sm:$0xff]  ;;  %s380_s21 = scalar_lea.vmem %s275_s20, 128  ;;  %p385_p9 = scmp.lt.s32.totalorder %s275_s20, %s275_s20 }
  0x1a   :  { %v45_v7 = vadd.s32 %v44_v5, %v41_v6  ;;  %327 = vmatprep.subr.mxu0 %v457_v4  ;;  %p381_p8 = scmp.ne.s32.totalorder %s275_s20, %s380_s21  ;;  %p386_p10 = scmp.lt.s32.totalorder %s380_s21, %s380_s21 }
  0x1c   :  { %47 = vperm.xlu0 %353, %v45_v7   ;;  %61 = vperm.xlu1 %355, %v45_v7   ;;  %p387_p11 = por %p386_p10, %p385_p9 }
  0x1d   :  { %328 = vmatpush3.msra.mxu0 %v76_v15 }
  0x1e   :  { %p388_p12 = pnand %p387_p11, %p381_p8 }
  0x20   :  { %354 = vset.pattern.permute.xlu0 %v458_v8  ;;  %356 = vset.pattern.permute.xlu1 %v459_v9 }
  0x21   :  { %54 = vperm.xlu0 %354, %v45_v7   ;;  %68 = vperm.xlu1 %356, %v45_v7  }
  0x25   :  { %357 = vset.pattern.permute.xlu0 %v459_v9 }
  0x9b   :  { %v48_v17 = vpop.permute.xlu0 %47  ;;  %v62_v18 = vpop.permute.xlu1 %61 }
  0x9c   :  { %vm49_vm2 = vcmp.eq.s32.totalorder %v43_v3, %v48_v17  ;;  %vm63_vm3 = vcmp.eq.s32.totalorder %v43_v3, %v62_v18 }
  0x9d   :  { %v310_v21 = vsel %vm49_vm2, 1.0, %v457_v4  ;;  %v312_v24 = vsel %vm63_vm3, 1.0, %v457_v4 }
  0xa0   :  { %v55_v19 = vpop.permute.xlu0 %54  ;;  %v69_v20 = vpop.permute.xlu1 %68 }
  0xa1   :  { %vm56_vm4 = vcmp.eq.s32.totalorder %v43_v3, %v55_v19  ;;  %vm70_vm5 = vcmp.eq.s32.totalorder %v43_v3, %v69_v20 }
  0xa2   :  { %v311_v22 = vsel %vm56_vm4, 1.0, %v457_v4  ;;  %v313_v25 = vsel %vm70_vm5, 1.0, %v457_v4 }
  0xa3   :  { %v59_v23 = vadd.f32 %v311_v22, %v310_v21 }
  0xa5   :  { %v66_v26 = vadd.f32 %v312_v24, %v59_v23 }
  0xa7   :  { %v73_v27 = vadd.f32 %v313_v25, %v66_v26 }
  0xa9   :  { %330 = vmatmul.mubr.msk.f32.vlgmr.msra.gmra.mrb[0].mxu0 %vm77_vm6, %v73_v27 }
  0xec   :  { %v221_v28 = vpop.f32.mrb[0].mxu1 }
  0xed   :  { %v336_v29 = vpop.f32.mrb[1].mxu1 }
 0x17c   :  { %v147_v30 = vpop.f32.mrb[0].mxu0 }
 0x17d   :  { %v222_v32 = vadd.f32 %v221_v28, %v147_v30  ;;  %v331_v33 = vpop.f32.mrb[1].mxu0 }
 0x17f   :  { %v232_v34 = vadd.f32 %v316_v31, %v222_v32 }
 0x181   :  { %v250_v35 = vrot.slane %v232_v34, 4  ;;  %v259_v36 = vmul.f32 %v232_v34, %v232_v34  ;;  %233 = vst [vmem:[#allocation5] sm:$0xff] %v232_v34 }
 0x182   :  { %391 = shalt.err (!%p388_p12)
}
 0x183   :  { %s392_s4 = scalar_lea.hbm %s578_s5, 128 }
 0x184   :  { %p393_p13 = scmp.ne.s32.totalorder %s578_s5, %s392_s4  ;;  %p396_p0 = scmp.lt.u32.totalorder %s392_s4, %s578_s5 }
 0x186   :  { %p398_p1 = pnand %p396_p0, %p393_p13 }
 0x188   :  { %401 = shalt.err (!%p398_p1)
}
 0x189   :  { %277 = dma.vmem_to_hbm [thread:$0]  %s275_s20, 128, %s578_s5, [#allocation4]   ;;  %v251_v37 = vadd.f32 %v250_v35, %v232_v34  ;;  %v260_v38 = vrot.slane %v259_v36, 4  ;;  %v249_v45 = vld [vmem:[#allocation6] sm:$0x1] }
 0x18a   :  { %s463_s30 = smov [#allocation6]   ;;  %v258_v48 = vld [vmem:[#allocation8] sm:$0x1]  ;;  %s464_s9 = smov [#allocation8]  }
 0x18b   :  { %v252_v39 = vrot.slane %v251_v37, 2  ;;  %v261_v40 = vadd.f32 %v260_v38, %v259_v36  ;;  %s284_s8 = sshll.u32 %s463_s30, 4  ;;  %s294_s10 = sshll.u32 %s464_s9, 4  ;;  %s285_s8 = int_to_ptr.vmem [resolvable:$true] %s284_s8  ;;  %s541_s10 = int_to_ptr.vmem [resolvable:$true] %s294_s10 }
 0x18c   :  { %s402_s5 = scalar_lea.vmem %s285_s8, 16  ;;  %s406_s11 = scalar_lea.vmem %s285_s8, 32 }
 0x18d   :  { %v253_v41 = vadd.f32 %v252_v39, %v251_v37  ;;  %v262_v42 = vrot.slane %v261_v40, 2  ;;  %p403_p2 = scmp.ne.s32.totalorder %s285_s8, %s402_s5  ;;  %p407_p3 = scmp.lt.s32.totalorder %s285_s8, %s285_s8 }
 0x18e   :  { %p408_p4 = scmp.lt.s32.totalorder %s406_s11, %s402_s5 }
 0x18f   :  { %v254_v43 = vrot.slane %v253_v41, 1  ;;  %v263_v44 = vadd.f32 %v262_v42, %v261_v40 }
 0x190   :  { %p409_p5 = por %p408_p4, %p407_p3 }
 0x191   :  { %v255_v46 = vadd.f32 %v254_v43, %v253_v41  ;;  %v264_v47 = vrot.slane %v263_v44, 1 }
 0x192   :  { %p410_p6 = pnand %p409_p5, %p403_p2 }
 0x193   :  { %v256_v49 = vadd.f32 %v255_v46, %v249_v45  ;;  %v265_v50 = vadd.f32 %v264_v47, %v263_v44 }
 0x195   :  { %257 = vst [vmem:[#allocation6] sm:$0x1] %v256_v49  ;;  %v266_v51 = vadd.f32 %v265_v50, %v258_v48 }
 0x196   :  { %413 = shalt.err (!%p410_p6)
}
 0x197   :  { %s414_s14 = scalar_lea.hbm %s579_s6, 16 }
 0x198   :  { %p415_p7 = scmp.ne.s32.totalorder %s579_s6, %s414_s14  ;;  %p418_p8 = scmp.lt.u32.totalorder %s414_s14, %s579_s6 }
 0x19a   :  { %p420_p9 = pnand %p418_p8, %p415_p7 }
 0x19c   :  { %423 = shalt.err (!%p420_p9)
}
 0x19d   :  { %287 = dma.vmem_to_hbm [thread:$0]  %s285_s8, 16, %s579_s6, [#allocation7]   ;;  %267 = vst [vmem:[#allocation8] sm:$0x1] %v266_v51 }
 0x19e   :  { %s424_s0 = scalar_lea.vmem %s541_s10, 16  ;;  %s428_s2 = scalar_lea.vmem %s541_s10, 32 }
 0x19f   :  { %p425_p10 = scmp.ne.s32.totalorder %s541_s10, %s424_s0  ;;  %p429_p11 = scmp.lt.s32.totalorder %s541_s10, %s541_s10 }
 0x1a0   :  { %p430_p12 = scmp.lt.s32.totalorder %s428_s2, %s424_s0 }
 0x1a2   :  { %p431_p13 = por %p430_p12, %p429_p11 }
 0x1a4   :  { %p432_p0 = pnand %p431_p13, %p425_p10 }
 0x1a6   :  { %435 = shalt.err (!%p432_p0)
}
 0x1a7   :  { %s436_s21 = scalar_lea.hbm %s580_s7, 16 }
 0x1a8   :  { %p437_p1 = scmp.ne.s32.totalorder %s580_s7, %s436_s21  ;;  %p440_p2 = scmp.lt.u32.totalorder %s436_s21, %s580_s7 }
 0x1aa   :  { %p442_p3 = pnand %p440_p2, %p437_p1 }
 0x1ac   :  { %445 = shalt.err (!%p442_p3)
}
 0x1ad   :  { %297 = dma.vmem_to_hbm [thread:$0]  %s541_s10, 16, %s580_s7, [#allocation7]  }
 0x1ae   :  { %448 = dma.done.wait [#allocation4], 128  }
 0x1af   :  { %449 = vsyncadd [#allocation4], 4294967168 }
 0x1b0   :  { %450 = dma.done.wait [#allocation7], 32  }
 0x1b1   :  { %451 = vsyncadd [#allocation7], 4294967264 }
 0x1b2   :  { %307 = vsyncpa [#allocation3], 1 }
 0x1b3   :  { %308 = vsyncpa [#allocation4], 1 }
 0x1b4   :  { %309 = vsyncpa [#allocation7], 1 }

</bundles_post_ra>
